<compile_context>
chip_gen: v6e
topology: v6e:2x2x1
jax: 0.10.0
libtpu: 0.0.40
codegen_flags: <defaults>
</compile_context>

<pallas_src>
import math

import jax
import jax.numpy as jnp
from jax.experimental import pallas as pl
from jax.experimental.pallas import tpu as pltpu

_LANES = 128
_SUBLANES = 8


def _round_up(x, m):
    return ((x + m - 1) // m) * m


def _sublane_quantum(dtype):
    """Native sublane tiling: 8 rows for 4-byte, 16 for 2-byte, 32 for 1-byte."""
    itemsize = jnp.dtype(dtype).itemsize
    return max(_SUBLANES, (_SUBLANES * 4) // max(itemsize, 1))


def _vmem_budgets():
    """Generation-aware (input budget, vmem_limit_bytes)."""
    vmem_cap = 64 * 1024 * 1024            # conservative default (v7x per-TC)
    try:
        info = pltpu.get_tpu_info()
        vmem_cap = int(getattr(info, "vmem_capacity_bytes", vmem_cap))
    except Exception:
        pass
    if vmem_cap >= 96 * 1024 * 1024:       # v5e / v6e: 128 MiB VMEM
        return 48 * 1024 * 1024, 80 * 1024 * 1024
    # v7x (64 MiB per TC) or unknown: stay at/below the 32 MiB scoped default.
    return 24 * 1024 * 1024, 32 * 1024 * 1024


def _choose_tile_rows(rows0, quantum, sum_itemsize, input_budget):
    """Largest row tile that fits the budget with <5% round-up padding waste."""
    # Per row of tile: double-buffered input blocks (real itemsizes) plus an
    # allowance for the f32 elementwise intermediates kept live in the body.
    per_row_bytes = 2 * _LANES * sum_itemsize + 4 * _LANES * 4
    cap = input_budget // per_row_bytes
    cap = min(cap, rows0)
    cap = max(quantum, (cap // quantum) * quantum)
    # Largest tile <= cap whose round-up waste is < 5% of rows0 (rows0 is a
    # multiple of quantum, so tile == quantum always gives zero waste).
    tr = cap
    while tr > quantum:
        if ((-rows0) % tr) * 20 <= rows0:
            return tr
        tr -= quantum
    return quantum


def _pack_lane_dense(x, total_rows):
    """Flatten to a lane-dense (total_rows, 128) view.

    When the flat size already equals total_rows*128 this is a layout-free
    reshape (no padded HBM copy).  Otherwise only the tail is zero-padded;
    padding is applied identically to both members of each pair, so the padded
    region contributes (0 - 0)^2 = 0.  Input dtype is preserved (bf16 stays
    bf16 in HBM; the up-cast happens in-register inside the kernel).
    """
    flat = jnp.reshape(jnp.asarray(x), (-1,))
    target = total_rows * _LANES
    n = flat.shape[0]
    if n != target:
        # TODO(synk): fuse this pad into the pallas_call input DMA via
        #             CompilerParams(allow_input_fusion=...) once the operand
        #             indexing convention is pinned down.
        flat = jnp.pad(flat, (0, target - n))
    return jnp.reshape(flat, (total_rows, _LANES))


def _make_crit_kernel(num_pairs, shared_src2, tile_rows):
    """Kernel body: (w_smem, src1_0..P-1, src2_0..{0|P-1}, out_slab)."""
    n_src2 = 1 if shared_src2 else num_pairs

    def kernel(w_ref, *refs):
        s1_refs = refs[:num_pairs]
        s2_refs = refs[num_pairs:num_pairs + n_src2]
        out_ref = refs[num_pairs + n_src2]        # (8, 128) f32 partial slab

        acc = jnp.zeros((_SUBLANES, _LANES), jnp.float32)
        for p in range(num_pairs):
            s1 = s1_refs[p][...].astype(jnp.float32)
            # Re-read (and upcast) the shared src2 per pair: it is already
            # resident in VMEM and vector loads are cheap (3 vld/cycle); this
            # avoids a tile-sized f32 temp living across the whole pair loop.
            s2_ref = s2_refs[0] if shared_src2 else s2_refs[p]
            s2 = s2_ref[...].astype(jnp.float32)
            d = s1 - s2
            sq = d * d                                        # VPU
            if tile_rows == _SUBLANES:
                part = sq
            else:
                # Groups whole (8,128) vregs; the sum over axis 0 is plain
                # elementwise vreg adds (VPU), no cross-lane XLU work.
                part = sq.reshape(
                    tile_rows // _SUBLANES, _SUBLANES, _LANES).sum(axis=0)
            acc = acc + w_ref[p] * part           # w already includes 1/denom
        out_ref[...] = acc

    return kernel


def _crit_forward_pallas(sources1, sources2, shared_src2, weights_arr):
    num_pairs = len(sources1)
    srcs = [jnp.asarray(s) for s in list(sources1) + list(sources2)]
    n_inputs = len(srcs)

    counts1 = [int(math.prod(s.shape)) for s in srcs[:num_pairs]]
    counts2 = [int(math.prod(s.shape)) for s in srcs[num_pairs:]]
    if shared_src2:
        # Zero-padding both members of a pair is only sound when they have the
        # same element count; with a shared src2, every src1 must match it.
        assert all(c == counts2[0] for c in counts1), (
            "shared src2 requires every src1 to have the same element count")
    else:
        assert all(c1 == c2 for c1, c2 in zip(counts1, counts2)), (
            "each (src1, src2) pair must have equal element counts")

    quantum = max(_sublane_quantum(s.dtype) for s in srcs)
    sum_itemsize = sum(jnp.dtype(s.dtype).itemsize for s in srcs)

    n_max = max(counts1 + counts2)
    rows0 = _round_up(max(pl.cdiv(n_max, _LANES), 1), quantum)

    input_budget, vmem_limit = _vmem_budgets()
    tile_rows = _choose_tile_rows(rows0, quantum, sum_itemsize, input_budget)
    total_rows = _round_up(rows0, tile_rows)   # waste bounded by tile choice
    grid_rows = total_rows // tile_rows

    packed = [_pack_lane_dense(s, total_rows) for s in srcs]

    bytes_accessed = sum(
        int(math.prod(p.shape)) * jnp.dtype(p.dtype).itemsize for p in packed
    ) + grid_rows * _SUBLANES * _LANES * 4
    cost = pl.CostEstimate(
        flops=3 * num_pairs * total_rows * _LANES,
        transcendentals=0,
        bytes_accessed=int(bytes_accessed),
    )

    kernel = _make_crit_kernel(num_pairs, shared_src2, tile_rows)

    # TODO(synk): for very large P (> ~8 pairs) concatenate the packed sources
    #             along the row axis into one stream (weight indexed per tile
    #             from SMEM) so per-input double buffers don't shrink the tile.
    partials = pl.pallas_call(
        kernel,
        out_shape=jax.ShapeDtypeStruct(
            (grid_rows, _SUBLANES, _LANES), jnp.float32),
        grid_spec=pltpu.PrefetchScalarGridSpec(
            num_scalar_prefetch=1,                 # weights / denom -> SMEM
            grid=(grid_rows,),
            in_specs=[
                pl.BlockSpec((tile_rows, _LANES), lambda r, w: (r, 0))
                for _ in range(n_inputs)
            ],
            out_specs=pl.BlockSpec((None, _SUBLANES, _LANES),
                                   lambda r, w: (r, 0, 0)),
        ),
        compiler_params=pltpu.CompilerParams(
            # Every grid step writes its own partial slab, so the row axis is
            # fully parallel; on v7x the compiler may split it across both
            # TensorCores.  v5e/v6e (1 TC) run it as a plain loop.
            dimension_semantics=("parallel",),
            vmem_limit_bytes=vmem_limit,
        ),
        cost_estimate=cost,
    )(weights_arr, *packed)

    # Tiny final reduce of the per-tile (8,128) partial slabs.
    return jnp.sum(partials)


class CritBase:
    """JAX/Pallas port of the PyTorch CritBase module (forward only)."""

    def __init__(self, keys, weights=1.0, batch_mean=True):
        self.keys = keys
        self.weights = weights
        self.batch_mean = batch_mean

    # TODO(synk): CritBase._step is abstract in the PyTorch reference; the
    #             representative step used here is sum((src1 - src2) ** 2) and
    #             ignores the extra `others` inputs.

    def forward(self, kwargs):
        sources1, sources2, *others = [kwargs[key] for key in self.keys]

        if not isinstance(sources1, list):
            sources1 = [sources1]
        shared_src2 = not isinstance(sources2, list)
        if shared_src2:
            src2_list = [sources2]          # shared src2 is passed exactly once
        else:
            assert len(sources1) == len(sources2)
            src2_list = list(sources2)

        weights = self.weights
        if not isinstance(weights, list):
            weights = [weights] * len(sources1)
        assert len(sources1) == len(weights)

        dinominator = float(sources1[0].shape[0]) if self.batch_mean else 1.0
        # weights / denominator travel as runtime data (scalar-prefetched into
        # SMEM): changing them never triggers a recompile and traced weights
        # are supported.
        weights_arr = jnp.asarray(weights, jnp.float32) / jnp.float32(dinominator)

        loss = _crit_forward_pallas(
            tuple(sources1), tuple(src2_list), shared_src2, weights_arr)
        return loss, dinominator


def _reference_forward(crit, kwargs):
    """Pure-JAX reference reproducing the PyTorch semantics."""
    sources1, sources2, *others = [kwargs[k] for k in crit.keys]
    if not isinstance(sources1, list):
        sources1 = [sources1]
    if not isinstance(sources2, list):
        sources2 = [sources2] * len(sources1)
    weights = crit.weights
    if not isinstance(weights, list):
        weights = [weights] * len(sources1)
    denom = float(sources1[0].shape[0]) if crit.batch_mean else 1.0
    loss = None
    for w, a, b in zip(weights, sources1, sources2):
        step = jnp.sum(
            (jnp.asarray(a, jnp.float32) - jnp.asarray(b, jnp.float32)) ** 2)
        term = w * step / denom
        loss = term if loss is None else loss + term
    return loss, denom


if __name__ == "__main__":
    key = jax.random.PRNGKey(0)
    k1, k2, k3 = jax.random.split(key, 3)

    # Case 1: shared src2, float32, per-pair weights, batch_mean=True.
    P, B, D = 3, 4, 32   # 3 source pairs, batch=4, hidden=32
    preds = [jax.random.normal(jax.random.fold_in(k1, i), (B, D), jnp.float32)
             for i in range(P)]
    target = jax.random.normal(k2, (B, D), jnp.float32)   # single shared src2
    crit = CritBase(keys=["pred", "target"], weights=[1.0, 0.5, 0.25],
                    batch_mean=True)
    kwargs = {"pred": preds, "target": target}
    loss, denom = crit.forward(kwargs)
    loss = jax.block_until_ready(loss)
    ref_loss, ref_denom = _reference_forward(crit, kwargs)
    assert denom == ref_denom
    assert jnp.allclose(loss, ref_loss, rtol=1e-5, atol=1e-5), (loss, ref_loss)

    # Case 2: per-pair src2, bfloat16 inputs, scalar weight, batch_mean=False.
    Q, shape = 2, (2, 3, 16, 16)
    a_list = [jax.random.normal(jax.random.fold_in(k3, 10 + i), shape,
                                jnp.float32).astype(jnp.bfloat16)
              for i in range(Q)]
    b_list = [jax.random.normal(jax.random.fold_in(k3, 20 + i), shape,
                                jnp.float32).astype(jnp.bfloat16)
              for i in range(Q)]
    crit2 = CritBase(keys=["a", "b"], weights=2.0, batch_mean=False)
    kwargs2 = {"a": a_list, "b": b_list}
    loss2, denom2 = crit2.forward(kwargs2)
    loss2 = jax.block_until_ready(loss2)
    ref2, refd2 = _reference_forward(crit2, kwargs2)
    assert denom2 == refd2
    assert jnp.allclose(loss2, ref2, rtol=1e-4, atol=1e-4), (loss2, ref2)

    print("KERNEL_OK")
</pallas_src>

<mosaic_0001>
module attributes {stable_mosaic.version = 11 : i64} {
  func.func @kernel(%arg0: i32, %arg1: memref<3xf32, #tpu.memory_space<smem>>, %arg2: memref<8x128xf32, #tpu.memory_space<vmem>>, %arg3: memref<8x128xf32, #tpu.memory_space<vmem>>, %arg4: memref<8x128xf32, #tpu.memory_space<vmem>>, %arg5: memref<8x128xf32, #tpu.memory_space<vmem>>, %arg6: memref<1x8x128xf32, #tpu.memory_space<vmem>>) attributes {dimension_semantics = [#tpu.dimension_semantics<parallel>], iteration_bounds = array<i64: 1>, scalar_prefetch = 1 : i64, scratch_operands = 0 : i64, tpu.core_type = #tpu.core_type<tc>, window_params = [{transform_indices = @transform_0, window_bounds = array<i64: 8, 128>}, {transform_indices = @transform_1, window_bounds = array<i64: 8, 128>}, {transform_indices = @transform_2, window_bounds = array<i64: 8, 128>}, {transform_indices = @transform_3, window_bounds = array<i64: 8, 128>}, {transform_indices = @transform_4, window_bounds = array<i64: 1, 8, 128>}]} {
    %cst = arith.constant 0.000000e+00 : f32
    %0 = vector.broadcast %cst : f32 to vector<8x128xf32>
    %c0 = arith.constant 0 : index
    %c0_0 = arith.constant 0 : index
    %1 = vector.load %arg2[%c0, %c0_0] : memref<8x128xf32, #tpu.memory_space<vmem>>, vector<8x128xf32>
    %c0_1 = arith.constant 0 : index
    %c0_2 = arith.constant 0 : index
    %2 = vector.load %arg5[%c0_1, %c0_2] : memref<8x128xf32, #tpu.memory_space<vmem>>, vector<8x128xf32>
    %3 = arith.subf %1, %2 : vector<8x128xf32>
    %4 = arith.mulf %3, %3 : vector<8x128xf32>
    %c0_3 = arith.constant 0 : index
    %5 = memref.load %arg1[%c0_3] : memref<3xf32, #tpu.memory_space<smem>>
    %6 = vector.broadcast %5 : f32 to vector<8x128xf32>
    %7 = arith.mulf %6, %4 : vector<8x128xf32>
    %8 = arith.addf %0, %7 : vector<8x128xf32>
    %c0_4 = arith.constant 0 : index
    %c0_5 = arith.constant 0 : index
    %9 = vector.load %arg3[%c0_4, %c0_5] : memref<8x128xf32, #tpu.memory_space<vmem>>, vector<8x128xf32>
    %c0_6 = arith.constant 0 : index
    %c0_7 = arith.constant 0 : index
    %10 = vector.load %arg5[%c0_6, %c0_7] : memref<8x128xf32, #tpu.memory_space<vmem>>, vector<8x128xf32>
    %11 = arith.subf %9, %10 : vector<8x128xf32>
    %12 = arith.mulf %11, %11 : vector<8x128xf32>
    %c1 = arith.constant 1 : index
    %13 = memref.load %arg1[%c1] : memref<3xf32, #tpu.memory_space<smem>>
    %14 = vector.broadcast %13 : f32 to vector<8x128xf32>
    %15 = arith.mulf %14, %12 : vector<8x128xf32>
    %16 = arith.addf %8, %15 : vector<8x128xf32>
    %c0_8 = arith.constant 0 : index
    %c0_9 = arith.constant 0 : index
    %17 = vector.load %arg4[%c0_8, %c0_9] : memref<8x128xf32, #tpu.memory_space<vmem>>, vector<8x128xf32>
    %c0_10 = arith.constant 0 : index
    %c0_11 = arith.constant 0 : index
    %18 = vector.load %arg5[%c0_10, %c0_11] : memref<8x128xf32, #tpu.memory_space<vmem>>, vector<8x128xf32>
    %19 = arith.subf %17, %18 : vector<8x128xf32>
    %20 = arith.mulf %19, %19 : vector<8x128xf32>
    %c2 = arith.constant 2 : index
    %21 = memref.load %arg1[%c2] : memref<3xf32, #tpu.memory_space<smem>>
    %22 = vector.broadcast %21 : f32 to vector<8x128xf32>
    %23 = arith.mulf %22, %20 : vector<8x128xf32>
    %24 = arith.addf %16, %23 : vector<8x128xf32>
    %c0_12 = arith.constant 0 : index
    %c0_13 = arith.constant 0 : index
    %c0_14 = arith.constant 0 : index
    %25 = vector.load %arg6[%c0_12, %c0_13, %c0_14] : memref<1x8x128xf32, #tpu.memory_space<vmem>>, vector<1x8x128xf32>
    %26 = vector.shape_cast %25 : vector<1x8x128xf32> to vector<8x128xf32>
    %27 = vector.shape_cast %24 : vector<8x128xf32> to vector<1x8x128xf32>
    tpu.vector_store %arg6[%c0_12, %c0_13, %c0_14], %27 {strides = array<i32>} : memref<1x8x128xf32, #tpu.memory_space<vmem>>, vector<1x8x128xf32>,
    return
  }
  func.func @transform_0(%arg0: i32, %arg1: memref<3xf32, #tpu.memory_space<smem>>) -> (i32, i32) {
    %c0_i32 = arith.constant 0 : i32
    %c0_i32_0 = arith.constant 0 : i32
    return %arg0, %c0_i32 : i32, i32
  }
  func.func @transform_1(%arg0: i32, %arg1: memref<3xf32, #tpu.memory_space<smem>>) -> (i32, i32) {
    %c0_i32 = arith.constant 0 : i32
    %c0_i32_0 = arith.constant 0 : i32
    return %arg0, %c0_i32 : i32, i32
  }
  func.func @transform_2(%arg0: i32, %arg1: memref<3xf32, #tpu.memory_space<smem>>) -> (i32, i32) {
    %c0_i32 = arith.constant 0 : i32
    %c0_i32_0 = arith.constant 0 : i32
    return %arg0, %c0_i32 : i32, i32
  }
  func.func @transform_3(%arg0: i32, %arg1: memref<3xf32, #tpu.memory_space<smem>>) -> (i32, i32) {
    %c0_i32 = arith.constant 0 : i32
    %c0_i32_0 = arith.constant 0 : i32
    return %arg0, %c0_i32 : i32, i32
  }
  func.func @transform_4(%arg0: i32, %arg1: memref<3xf32, #tpu.memory_space<smem>>) -> (i32, i32, i32) {
    %c0_i32 = arith.constant 0 : i32
    %c0_i32_0 = arith.constant 0 : i32
    %c0_i32_1 = arith.constant 0 : i32
    return %arg0, %c0_i32, %c0_i32_0 : i32, i32, i32
  }
}

</mosaic_0001>

<bundles_post_ra>
// kernel: tpu_custom_call.1
= control target key start
LH: loop header
LB: loop body
LE: loop exit
PB: predicated region body
PF: predicated region fallthrough
CT: control target
= control target key end

     0   :  { %s236_s18 = smov [#allocation3]   ;;  %s290_s0 = inlined_call_operand.hbm [shape: f32[3], index: 0, kind: input, shape index: {}]   ;;  %s291_s1 = inlined_call_operand.hbm [shape: f32[8,128], index: 1, kind: input, shape index: {}]   ;;  %s292_s2 = inlined_call_operand.hbm [shape: f32[8,128], index: 2, kind: input, shape index: {}]   ;;  %s293_s3 = inlined_call_operand.hbm [shape: f32[8,128], index: 3, kind: input, shape index: {}]   ;;  %s294_s4 = inlined_call_operand.hbm [shape: f32[8,128], index: 4, kind: input, shape index: {}]   ;;  %s295_s5 = inlined_call_operand.hbm [shape: f32[1,8,128], index: 5, kind: output, shape index: {}]  }
   0x1   :  { %11 = dma.hbm_to_smem %s290_s0, 16, %s236_s18, [#allocation2] }
   0x2   :  { %226 = dma.done.wait [#allocation2], 16 }
   0x3   :  { %227 = vsyncadd [#allocation2], 4294967280 }
   0x4   :  { %13 = sfence }
   0x5   :  { %14 = vsyncpa [#allocation5], 0 }
   0x6   :  { %15 = vsyncpa [#allocation8], 0 }
   0x7   :  { %16 = vsyncpa [#allocation11], 0 }
   0x8   :  { %17 = vsyncpa [#allocation6], 0  ;;  %s237_s21 = smov [#allocation7]   ;;  %s238_s23 = smov [#allocation4]  }
   0x9   :  { %s34_s22 = sshll.u32 %s237_s21, 4  ;;  %s24_s24 = sshll.u32 %s238_s23, 4  ;;  %s35_s22 = int_to_ptr.vmem [resolvable:$true] %s34_s22  ;;  %s25_s24 = int_to_ptr.vmem [resolvable:$true] %s24_s24 }
   0xa   :  { %s134_s25 = scalar_lea.vmem %s35_s22, 128  ;;  %p139_p1 = scmp.lt.s32.totalorder %s35_s22, %s35_s22 }
   0xb   :  { %p135_p0 = scmp.ne.s32.totalorder %s35_s22, %s134_s25  ;;  %p140_p2 = scmp.lt.s32.totalorder %s134_s25, %s134_s25 }
   0xd   :  { %p141_p3 = por %p140_p2, %p139_p1 }
   0xf   :  { %p142_p4 = pnand %p141_p3, %p135_p0 }
  0x11   :  { %145 = shalt.err (!%p142_p4)
}
  0x12   :  { %37 = dma.hbm_to_vmem [thread:$0]  %s292_s2, 128, %s35_s22, [#allocation8]  }
  0x13   :  { %s154_s27 = scalar_lea.vmem %s25_s24, 128  ;;  %p159_p6 = scmp.lt.s32.totalorder %s25_s24, %s25_s24 }
  0x14   :  { %p155_p5 = scmp.ne.s32.totalorder %s25_s24, %s154_s27  ;;  %p160_p7 = scmp.lt.s32.totalorder %s154_s27, %s154_s27 }
  0x16   :  { %p161_p8 = por %p160_p7, %p159_p6 }
  0x18   :  { %p162_p9 = pnand %p161_p8, %p155_p5 }
  0x1a   :  { %165 = shalt.err (!%p162_p9)
}
  0x1b   :  { %27 = dma.hbm_to_vmem [thread:$0]  %s291_s1, 128, %s25_s24, [#allocation5]  }
  0x1c   :  { %s239_s30 = smov [#allocation9]   ;;  %s240_s7 = smov [#allocation10]  }
  0x1d   :  { %s44_s6 = sshll.u32 %s239_s30, 4  ;;  %s54_s8 = sshll.u32 %s240_s7, 4  ;;  %s45_s6 = int_to_ptr.vmem [resolvable:$true] %s44_s6  ;;  %s55_s8 = int_to_ptr.vmem [resolvable:$true] %s54_s8 }
  0x1e   :  { %s174_s9 = scalar_lea.vmem %s45_s6, 128  ;;  %p179_p11 = scmp.lt.s32.totalorder %s45_s6, %s45_s6 }
  0x1f   :  { %p175_p10 = scmp.ne.s32.totalorder %s45_s6, %s174_s9  ;;  %p180_p12 = scmp.lt.s32.totalorder %s174_s9, %s174_s9 }
  0x21   :  { %p181_p13 = por %p180_p12, %p179_p11 }
  0x23   :  { %p182_p0 = pnand %p181_p13, %p175_p10 }
  0x25   :  { %185 = shalt.err (!%p182_p0)
}
  0x26   :  { %47 = dma.hbm_to_vmem [thread:$0]  %s293_s3, 128, %s45_s6, [#allocation8]  }
  0x27   :  { %s194_s11 = scalar_lea.vmem %s55_s8, 128  ;;  %p199_p2 = scmp.lt.s32.totalorder %s55_s8, %s55_s8 }
  0x28   :  { %p195_p1 = scmp.ne.s32.totalorder %s55_s8, %s194_s11  ;;  %p200_p3 = scmp.lt.s32.totalorder %s194_s11, %s194_s11 }
  0x2a   :  { %p201_p4 = por %p200_p3, %p199_p2 }
  0x2c   :  { %p202_p5 = pnand %p201_p4, %p195_p1 }
  0x2e   :  { %205 = shalt.err (!%p202_p5)
}
  0x2f   :  { %57 = dma.hbm_to_vmem [thread:$0]  %s294_s4, 128, %s55_s8, [#allocation11]  }
  0x30   :  { %228 = dma.done.wait [#allocation5], 128  }
  0x31   :  { %229 = vsyncadd [#allocation5], 4294967168 }
  0x32   :  { %230 = dma.done.wait [#allocation8], 256  }
  0x33   :  { %231 = vsyncadd [#allocation8], 4294967040 }
  0x34   :  { %232 = dma.done.wait [#allocation11], 128  }
  0x35   :  { %233 = vsyncadd [#allocation11], 4294967168  ;;  %s74_s13 = sld [smem:[#allocation3]]  ;;  %v70_v0 = vld [vmem:[#allocation4] sm:$0xff]  ;;  %v71_v1 = vld [vmem:[#allocation10] sm:$0xff]  ;;  %s241_s4 = smov [#allocation12]  }
  0x36   :  { %s110_s14 = sld [smem:[#allocation3 + $0x1]]  ;;  %v78_v2 = vld [vmem:[#allocation7] sm:$0xff]  ;;  %v72_v3 = vsub.f32 %v70_v0, %v71_v1  ;;  %v85_v5 = vld [vmem:[#allocation9] sm:$0xff]  ;;  %s99_s15 = sshll.u32 %s241_s4, 4  ;;  %s100_s15 = int_to_ptr.vmem [resolvable:$true] %s99_s15 }
  0x37   :  { %s111_s3 = sld [smem:[#allocation3 + $0x2]]  ;;  %v79_v4 = vsub.f32 %v78_v2, %v71_v1  ;;  %v86_v8 = vsub.f32 %v85_v5, %v71_v1  ;;  %s206_s16 = scalar_lea.vmem %s100_s15, 128 }
  0x38   :  { %v73_v9 = vmul.f32 %v72_v3, %v72_v3  ;;  %p207_p6 = scmp.ne.s32.totalorder %s100_s15, %s206_s16  ;;  %p211_p7 = scmp.lt.s32.totalorder %s100_s15, %s100_s15 }
  0x39   :  { %v80_v10 = vmul.f32 %v79_v4, %v79_v4  ;;  %v87_v12 = vmul.f32 %v86_v8, %v86_v8  ;;  %p212_p8 = scmp.lt.s32.totalorder %s206_s16, %s206_s16 }
  0x3b   :  { %v75_v6 = vstv %s74_s13  ;;  %p213_p9 = por %p212_p8, %p211_p7 }
  0x3c   :  { %v82_v7 = vstv %s110_s14  ;;  %v76_v13 = vmul.f32 %v75_v6, %v73_v9 }
  0x3d   :  { %v89_v11 = vstv %s111_s3  ;;  %v83_v14 = vmul.f32 %v82_v7, %v80_v10  ;;  %p214_p10 = pnand %p213_p9, %p207_p6 }
  0x3e   :  { %v90_v15 = vmul.f32 %v89_v11, %v87_v12 }
  0x3f   :  { %v84_v16 = vadd.f32 %v83_v14, %v76_v13 }
  0x41   :  { %v91_v17 = vadd.f32 %v90_v15, %v84_v16 }
  0x43   :  { %92 = vst [vmem:[#allocation12] sm:$0xff] %v91_v17 }
  0x44   :  { %217 = shalt.err (!%p214_p10)
}
  0x45   :  { %102 = dma.vmem_to_hbm [thread:$0]  %s100_s15, 128, %s295_s5, [#allocation6]  }
  0x46   :  { %234 = dma.done.wait [#allocation6], 128  }
  0x47   :  { %235 = vsyncadd [#allocation6], 4294967168 }
  0x48   :  { %106 = vsyncpa [#allocation5], 1 }
  0x49   :  { %107 = vsyncpa [#allocation8], 1 }
  0x4a   :  { %108 = vsyncpa [#allocation11], 1 }
  0x4b   :  { %109 = vsyncpa [#allocation6], 1 }

</bundles_post_ra>
